<compile_context>
chip_gen: v7x
topology: tpu7x:2x2x1
jax: 0.10.0
libtpu: 0.0.40
codegen_flags: <defaults>
</compile_context>

<pallas_src>
import functools

import jax
import jax.numpy as jnp
from jax.experimental import pallas as pl
from jax.experimental.pallas import tpu as pltpu


def _dice_sums_kernel(pred_ref, tgt_ref, out_ref, *, hw, tile, tiles_per_chunk):
    """Accumulate per-class (intersection, pred_sum, target_sum) over pixel tiles.

    pred_ref: (1, C, TILE) logits block        (classes on sublanes, pixels on lanes)
    tgt_ref:  (1, 1, TILE) int32 labels block
    out_ref:  (1, 3, C)    per-(sample, chunk) sums, resident across the tile axis
    """
    u = pl.program_id(1)   # pixel-chunk index (parallel)
    j = pl.program_id(2)   # tile index within chunk (reduction axis, innermost)

    @pl.when(j == 0)
    def _():
        out_ref[...] = jnp.zeros_like(out_ref)

    logits = pred_ref[0].astype(jnp.float32)   # (C, TILE) -- f32 math even for bf16 in
    tgt = tgt_ref[0]                           # (1, TILE) int32

    ragged = (hw % tile) != 0
    if ragged:
        # Validity from the global pixel index (row-width ops only).
        t = u * tiles_per_chunk + j
        pix = jax.lax.broadcasted_iota(jnp.int32, tgt.shape, 1) + t * tile
        valid = pix < hw                                   # (1, TILE) bool
        # Mask logits BEFORE exp so unspecified tail values can't become Inf/NaN.
        logits = jnp.where(valid, logits, 0.0)
        # Tail labels -> -1: never matches the class iota, so one-hot is 0 there.
        tgt = jnp.where(valid, tgt, -1)

    # Softmax over the class (sublane) axis.
    m = jnp.max(logits, axis=0, keepdims=True)             # (1, TILE)
    e = jnp.exp(logits - m)                                 # (C, TILE)
    denom = jnp.sum(e, axis=0, keepdims=True)               # (1, TILE)
    recip = pl.reciprocal(denom, approx=True)               # EUP slot, frees VPU
    if ragged:
        recip = jnp.where(valid, recip, 0.0)                # row-width mask only
    probs = e * recip                                       # (C, TILE)

    # One-hot via sublane iota compare along the class axis.
    cls = jax.lax.broadcasted_iota(jnp.int32, logits.shape, 0)   # (C, TILE)
    onehot = (cls == tgt).astype(jnp.float32)                    # (C, TILE)

    # Per-tile cross-lane (XLU) reduce straight into the resident output block.
    contrib = jnp.stack([probs * onehot, probs, onehot], axis=0)  # (3, C, TILE)
    out_ref[0] = out_ref[0] + jnp.sum(contrib, axis=-1)           # (3, C)


@functools.partial(jax.jit, static_argnames=("smooth", "max_tile"))
def dice_loss(predictions, targets, smooth=1e-05, max_tile=None):
    """predictions: (N, C, H, W) float (f32 or bf16); targets: (N, H, W) int labels."""
    n, c, h, w = predictions.shape
    hw = h * w
    itemsize = predictions.dtype.itemsize

    # Native-layout reshape only (free) -- no transpose, no padding pass over HBM.
    pred3d = predictions.reshape(n, c, hw)
    tgt3d = targets.reshape(n, 1, hw).astype(jnp.int32)

    # --- pixel-tile selection (all static) ----------------------------------
    hw128 = ((hw + 127) // 128) * 128
    # Target ~1 MiB of prediction bytes per grid step (>=512 KiB blocks measured
    # at ~85% of HBM roofline; amortises the ~0.35 us per-step overhead).
    target_pred_bytes = 1 << 20
    tile = max(128, ((target_pred_bytes // (c * itemsize)) // 128) * 128)
    # Keep the pipelined buffer footprint comfortably inside v7x's 64 MiB VMEM.
    vmem_buf_budget = 24 << 20
    per_pixel_bytes = 2 * c * itemsize + 2 * 4        # 2x pred buf + 2x label buf
    tile = min(tile, max(128, ((vmem_buf_budget // per_pixel_bytes) // 128) * 128))
    if max_tile is not None:
        tile = min(tile, max(128, (max_tile // 128) * 128))
    tile = min(tile, hw128)
    if tile >= hw:
        tile = hw          # single full-row block (full-dim block always legal)

    n_tiles = (hw + tile - 1) // tile                 # ragged tail masked in-kernel
    # Second "parallel" axis over pixel chunks so v7x megacore has work even when
    # N == 1 or odd; harmless on single-TC v5e/v6e.
    n_chunks = 2 if (n_tiles % 2 == 0 and n_tiles >= 2) else 1
    tpc = n_tiles // n_chunks
    grid = (n, n_chunks, tpc)

    buf_bytes = 2 * c * tile * itemsize + 2 * tile * 4 + 4 * 3 * c * 4
    vmem_limit = int(min(48 << 20, max(32 << 20, 2 * buf_bytes)))

    kernel = functools.partial(_dice_sums_kernel, hw=hw, tile=tile,
                               tiles_per_chunk=tpc)

    sums = pl.pallas_call(
        kernel,
        out_shape=jax.ShapeDtypeStruct((n * n_chunks, 3, c), jnp.float32),
        grid_spec=pltpu.PrefetchScalarGridSpec(
            num_scalar_prefetch=0,
            grid=grid,
            in_specs=[
                pl.BlockSpec((1, c, tile), lambda i, u, j: (i, 0, u * tpc + j)),
                pl.BlockSpec((1, 1, tile), lambda i, u, j: (i, 0, u * tpc + j)),
            ],
            out_specs=pl.BlockSpec((1, 3, c),
                                   lambda i, u, j: (i * n_chunks + u, 0, 0)),
        ),
        compiler_params=pltpu.CompilerParams(
            dimension_semantics=("parallel", "parallel", "arbitrary"),
            vmem_limit_bytes=vmem_limit),
    )(pred3d, tgt3d)

    totals = jnp.sum(sums, axis=0)        # (3, C): sum per-(sample, chunk) partials
    intersection = totals[0]
    pred_sum = totals[1]
    tgt_sum = totals[2]
    dice = (2.0 * intersection + smooth) / (pred_sum + tgt_sum + smooth)
    return 1.0 - jnp.mean(dice)


def _dice_loss_ref(predictions, targets, smooth=1e-05):
    """Pure-JAX reference mirroring the PyTorch forward."""
    probs = jax.nn.softmax(predictions.astype(jnp.float32), axis=1)
    c = predictions.shape[1]
    onehot = jax.nn.one_hot(targets, c, axis=1, dtype=probs.dtype)
    dice_scores = []
    for k in range(c):
        pred_c = probs[:, k].reshape(-1)
        tgt_c = onehot[:, k].reshape(-1)
        inter = jnp.sum(pred_c * tgt_c)
        dice = (2.0 * inter + smooth) / (jnp.sum(pred_c) + jnp.sum(tgt_c) + smooth)
        dice_scores.append(dice)
    return 1.0 - jnp.mean(jnp.stack(dice_scores))


if __name__ == "__main__":
    key = jax.random.PRNGKey(0)
    kp, kt, kp2, kt2 = jax.random.split(key, 4)

    # Primary small test matching the module's expected layout.
    N, C, H, W = 2, 4, 16, 16
    predictions = jax.random.normal(kp, (N, C, H, W), dtype=jnp.float32)
    targets = jax.random.randint(kt, (N, H, W), 0, C, dtype=jnp.int32)

    loss = dice_loss(predictions, targets)
    jax.block_until_ready(loss)
    ref = _dice_loss_ref(predictions, targets)
    assert jnp.allclose(loss, ref, atol=2e-3, rtol=2e-3), (loss, ref)

    # Ragged-tail + pixel-chunk path: hw=500 is not a multiple of the 128-wide
    # tile (in-kernel mask), N=1 / odd C exercises the extra parallel axis.
    p2 = jax.random.normal(kp2, (1, 3, 25, 20), dtype=jnp.float32)
    t2 = jax.random.randint(kt2, (1, 25, 20), 0, 3, dtype=jnp.int32)
    loss2 = dice_loss(p2, t2, max_tile=128)
    jax.block_until_ready(loss2)
    ref2 = _dice_loss_ref(p2, t2)
    assert jnp.allclose(loss2, ref2, atol=2e-3, rtol=2e-3), (loss2, ref2)

    # bf16 predictions feed the kernel directly (halved HBM traffic); math stays f32.
    p_bf16 = predictions.astype(jnp.bfloat16)
    loss3 = dice_loss(p_bf16, targets)
    jax.block_until_ready(loss3)
    ref3 = _dice_loss_ref(p_bf16, targets)
    assert jnp.allclose(loss3, ref3, atol=2e-3, rtol=2e-3), (loss3, ref3)

    print("KERNEL_OK")
</pallas_src>

<mosaic_0001>
module attributes {stable_mosaic.version = 11 : i64} {
  func.func @_dice_sums_kernel(%arg0: i32, %arg1: i32, %arg2: i32, %arg3: memref<1x4x256xf32, #tpu.memory_space<vmem>>, %arg4: memref<1x1x256xi32, #tpu.memory_space<vmem>>, %arg5: memref<1x3x4xf32, #tpu.memory_space<vmem>>) attributes {dimension_semantics = [#tpu.dimension_semantics<parallel>, #tpu.dimension_semantics<parallel>, #tpu.dimension_semantics<arbitrary>], iteration_bounds = array<i64: 2, 1, 1>, scalar_prefetch = 0 : i64, scratch_operands = 0 : i64, tpu.core_type = #tpu.core_type<tc>, window_params = [{transform_indices = @transform_0, window_bounds = array<i64: 1, 4, 256>}, {transform_indices = @transform_1, window_bounds = array<i64: 1, 1, 256>}, {transform_indices = @transform_2, window_bounds = array<i64: 1, 3, 4>}]} {
    %c0_i32 = arith.constant 0 : i32
    %0 = arith.cmpi eq, %arg2, %c0_i32 : i32
    %1 = arith.extui %0 : i1 to i32
    %c0_i32_0 = arith.constant 0 : i32
    %2 = arith.cmpi ne, %1, %c0_i32_0 : i32
    scf.if %2 {
      %cst_14 = arith.constant 0.000000e+00 : f32
      %34 = vector.broadcast %cst_14 : f32 to vector<1x3x4xf32>
      %c0_15 = arith.constant 0 : index
      %c0_16 = arith.constant 0 : index
      %c0_17 = arith.constant 0 : index
      %35 = vector.load %arg5[%c0_15, %c0_16, %c0_17] : memref<1x3x4xf32, #tpu.memory_space<vmem>>, vector<1x3x4xf32>
      tpu.vector_store %arg5[%c0_15, %c0_16, %c0_17], %34 {strides = array<i32>} : memref<1x3x4xf32, #tpu.memory_space<vmem>>, vector<1x3x4xf32>,
    } else {
    }
    %c0 = arith.constant 0 : index
    %c0_1 = arith.constant 0 : index
    %c0_2 = arith.constant 0 : index
    %3 = vector.load %arg3[%c0, %c0_1, %c0_2] : memref<1x4x256xf32, #tpu.memory_space<vmem>>, vector<1x4x256xf32>
    %4 = vector.shape_cast %3 : vector<1x4x256xf32> to vector<4x256xf32>
    %c0_3 = arith.constant 0 : index
    %c0_4 = arith.constant 0 : index
    %c0_5 = arith.constant 0 : index
    %5 = vector.load %arg4[%c0_3, %c0_4, %c0_5] : memref<1x1x256xi32, #tpu.memory_space<vmem>>, vector<1x1x256xi32>
    %6 = vector.shape_cast %5 : vector<1x1x256xi32> to vector<1x256xi32>
    %cst = arith.constant dense<0xFF800000> : vector<256xf32>
    %7 = vector.multi_reduction <maximumf>, %4, %cst [0] : vector<4x256xf32> to vector<256xf32>
    %8 = vector.shape_cast %7 : vector<256xf32> to vector<1x256xf32>
    %9 = vector.broadcast %8 : vector<1x256xf32> to vector<4x256xf32>
    %10 = arith.subf %4, %9 : vector<4x256xf32>
    %11 = math.exp %10 : vector<4x256xf32>
    %cst_6 = arith.constant dense<0.000000e+00> : vector<256xf32>
    %12 = vector.multi_reduction <add>, %11, %cst_6 [0] : vector<4x256xf32> to vector<256xf32>
    %13 = vector.shape_cast %12 : vector<256xf32> to vector<1x256xf32>
    %14 = tpu.reciprocal %13 {approx = true} : vector<1x256xf32> -> vector<1x256xf32>
    %15 = vector.broadcast %14 : vector<1x256xf32> to vector<4x256xf32>
    %16 = arith.mulf %11, %15 : vector<4x256xf32>
    %17 = tpu.iota {dimensions = array<i32: 0>} : vector<4x256xi32>
    %18 = vector.broadcast %6 : vector<1x256xi32> to vector<4x256xi32>
    %19 = arith.cmpi eq, %17, %18 : vector<4x256xi32>
    %20 = arith.extui %19 : vector<4x256xi1> to vector<4x256xi32>
    %21 = arith.sitofp %20 : vector<4x256xi32> to vector<4x256xf32>
    %22 = arith.mulf %16, %21 : vector<4x256xf32>
    %23 = vector.shape_cast %22 : vector<4x256xf32> to vector<1x4x256xf32>
    %24 = vector.shape_cast %16 : vector<4x256xf32> to vector<1x4x256xf32>
    %25 = vector.shape_cast %21 : vector<4x256xf32> to vector<1x4x256xf32>
    %26 = tpu.concatenate %23, %24, %25 in 0 : vector<1x4x256xf32>, vector<1x4x256xf32>, vector<1x4x256xf32> -> vector<3x4x256xf32>
    %c0_7 = arith.constant 0 : index
    %c0_8 = arith.constant 0 : index
    %c0_9 = arith.constant 0 : index
    %27 = vector.load %arg5[%c0_7, %c0_8, %c0_9] : memref<1x3x4xf32, #tpu.memory_space<vmem>>, vector<1x3x4xf32>
    %28 = vector.shape_cast %27 : vector<1x3x4xf32> to vector<3x4xf32>
    %cst_10 = arith.constant dense<0.000000e+00> : vector<3x4xf32>
    %29 = vector.multi_reduction <add>, %26, %cst_10 [2] : vector<3x4x256xf32> to vector<3x4xf32>
    %30 = arith.addf %28, %29 : vector<3x4xf32>
    %c0_11 = arith.constant 0 : index
    %c0_12 = arith.constant 0 : index
    %c0_13 = arith.constant 0 : index
    %31 = vector.load %arg5[%c0_11, %c0_12, %c0_13] : memref<1x3x4xf32, #tpu.memory_space<vmem>>, vector<1x3x4xf32>
    %32 = vector.shape_cast %31 : vector<1x3x4xf32> to vector<3x4xf32>
    %33 = vector.shape_cast %30 : vector<3x4xf32> to vector<1x3x4xf32>
    tpu.vector_store %arg5[%c0_11, %c0_12, %c0_13], %33 {strides = array<i32>} : memref<1x3x4xf32, #tpu.memory_space<vmem>>, vector<1x3x4xf32>,
    return
  }
  func.func @transform_0(%arg0: i32, %arg1: i32, %arg2: i32) -> (i32, i32, i32) {
    %c1_i32 = arith.constant 1 : i32
    %0 = arith.muli %arg1, %c1_i32 : i32
    %1 = arith.addi %0, %arg2 : i32
    %c0_i32 = arith.constant 0 : i32
    %c0_i32_0 = arith.constant 0 : i32
    return %arg0, %c0_i32, %1 : i32, i32, i32
  }
  func.func @transform_1(%arg0: i32, %arg1: i32, %arg2: i32) -> (i32, i32, i32) {
    %c1_i32 = arith.constant 1 : i32
    %0 = arith.muli %arg1, %c1_i32 : i32
    %1 = arith.addi %0, %arg2 : i32
    %c0_i32 = arith.constant 0 : i32
    %c0_i32_0 = arith.constant 0 : i32
    return %arg0, %c0_i32, %1 : i32, i32, i32
  }
  func.func @transform_2(%arg0: i32, %arg1: i32, %arg2: i32) -> (i32, i32, i32) {
    %c1_i32 = arith.constant 1 : i32
    %0 = arith.muli %arg0, %c1_i32 : i32
    %1 = arith.addi %0, %arg1 : i32
    %c0_i32 = arith.constant 0 : i32
    %c0_i32_0 = arith.constant 0 : i32
    %c0_i32_1 = arith.constant 0 : i32
    return %1, %c0_i32, %c0_i32_0 : i32, i32, i32
  }
}

</mosaic_0001>

<bundles_post_ra>
// kernel: dice_loss.1
= control target key start
LH: loop header
LB: loop body
LE: loop exit
PB: predicated region body
PF: predicated region fallthrough
CT: control target
= control target key end

     0   :  { %s532_s9 = smov 0   ;;  %s534_s10 = smov 0   ;;  %s588_s0 = inlined_call_operand.vmem [shape: f32[2,4,256], index: 0, kind: input, shape index: {}]   ;;  %s589_s1 = inlined_call_operand.vmem [shape: s32[2,1,256], index: 1, kind: input, shape index: {}]   ;;  %s590_s2 = inlined_call_operand.vmem [shape: f32[2,3,4], index: 2, kind: output, shape index: {}]  }
   0x1   :  { %s536_s11 = smov 0  }
   0x2 LB: > { %s31_s12 = sadd.s32 1, %s510_s10  ;;  %p449_p0 = scmp.ge.s32.totalorder %s514_s11, 1  ;;  %s514_s11 = sphi %s536_s11, %s12_s11   ;;  %s510_s10 = sphi %s534_s10, %s592_s10   ;;  %s506_s9 = sphi %s532_s9, %s591_s9  }
   0x3   : > { %p33_p1 = scmp.ge.s32.totalorder %s31_s12, 2  ;;  %p164_p2 = scmp.lt.s32.totalorder %s514_s11, 3 }
   0x5   : > { %s594_s12 = smov (%p33_p1, %s31_s12), 0  ;;  %p165_p3 = pnand %p449_p0, %p164_p2 }
   0x6   : > { %p202_p4 = scmp.lt.s32.totalorder (!%p165_p3), %s506_s9, 1  ;;  %v286_v0 = vlaneseq (!%p165_p3)  ;;  %vm240_vm0 = vcmask (!%p165_p3), 1043456   ;;  %v516_v16 = vmov (!%p165_p3), 0.0   ;;  %vm233_vm3 = vcmask (!%p165_p3), 26624  }
   0x7   : > { %168 = sbr.rel (%p165_p3) target bundleno = 240 (0xf0), region = 28  ;;  %vm348_vm4 = vcmask (!%p165_p3), 1041409   ;;  %vm350_vm5 = vcmask (!%p165_p3), 1042434  }
   0x8   : > { %v287_v1 = vshrl.u32 (!%p165_p3), %v286_v0, 7  ;;  %v335_v2 = vand.u32 (!%p165_p3), 127, %v286_v0 }
   0xa   : > { %v290_v3 = vsub.s32 (!%p165_p3), 0, %v287_v1  ;;  %v294_v4 = vsub.s32 (!%p165_p3), 1, %v287_v1  ;;  %v554_v5 = vsub.s32 (!%p165_p3), %v335_v2, %v287_v1 }
   0xe   : > { %s596_s9 = smov (!%p202_p4, %s506_s9), 1 }
   0xf   : > { %s459_s13 = sshll.u32 %s596_s9, 3  ;;  %s452_s14 = sshll.u32 %s596_s9, 1 }
  0x10   : > { %s209_s17 = scalar_lea.vmem %s588_s0, %s459_s13  ;;  %s220_s20 = scalar_lea.vmem %s589_s1, %s452_s14 }
  0x11   : > { %v235_v6 = vld [vmem:[%s209_s17] sm:$0xff]  ;;  %s453_s21 = sshll.u32 %s596_s9, 2 }
  0x12   : > { %v236_v7 = vld [vmem:[%s220_s20] sm:$0x3]  ;;  %v238_v8 = vcombine.high %v235_v6, %v235_v6  ;;  %v241_v9 = vsel %vm240_vm0, %v235_v6, -inf  ;;  %s227_s24 = scalar_lea.vmem %s590_s2, %s453_s21 }
  0x13   : > { %v291_v10 = vrot.slane %v236_v7, %v290_v3  ;;  %v295_v11 = vrot.slane %v236_v7, %v294_v4  ;;  %v242_v12 = vrot.slane %v241_v9, 4  ;;  %234 = vst.msk [vmem:[%s227_s24] sm:$0x7] %vm233_vm3, %v516_v16 }
  0x14   : > { %v248_v13 = vsel %vm240_vm0, %v238_v8, -inf }
  0x15   : > { %vm296_vm1 = vcmp.eq.s32.totalorder %v287_v1, %v291_v10  ;;  %vm297_vm2 = vcmp.eq.s32.totalorder %v287_v1, %v295_v11  ;;  %v243_v14 = vmax.f32 %v241_v9, %v242_v12  ;;  %v249_v15 = vrot.slane %v248_v13, 4 }
  0x16   : > { %v454_v17 = vsel %vm296_vm1, 1.0, %v516_v16  ;;  %v455_v18 = vsel %vm297_vm2, 1.0, %v516_v16 }
  0x17   : > { %v304_v19 = vcombine.low %v454_v17, %v455_v18  ;;  %v456_v20 = vcombine.low %v455_v18, %v455_v18  ;;  %v244_v21 = vrot.slane %v243_v14, 2  ;;  %v250_v22 = vmax.f32 %v248_v13, %v249_v15 }
  0x19   : > { %v326_v23 = vsel %vm240_vm0, %v304_v19, 0.0  ;;  %v327_v24 = vsel %vm240_vm0, %v456_v20, 0.0  ;;  %v245_v25 = vmax.f32 %v243_v14, %v244_v21  ;;  %v251_v26 = vrot.slane %v250_v22, 2 }
  0x1a   : > { %v328_v27 = vadd.f32 %v327_v24, %v326_v23  ;;  %v307_v8 = vld [vmem:[%s227_s24] sm:$0x7] }
  0x1b   : > { %v246_v28 = vrot.slane %v245_v25, 1  ;;  %v252_v29 = vmax.f32 %v250_v22, %v251_v26 }
  0x1c   : > { %329 = vadd.xlane.f32.xlu1 %v328_v27 }
  0x1d   : > { %v247_v30 = vmax.f32 %v245_v25, %v246_v28  ;;  %v253_v31 = vrot.slane %v252_v29, 1 }
  0x1f   : > { %v254_v32 = vmax.f32 %v252_v29, %v253_v31 }
  0x21   : > { %v257_v33 = vcombine.low %v247_v30, %v254_v32 }
  0x23   : > { %v259_v34 = vsub.f32 %v235_v6, %v257_v33 }
  0x25   : > { %v260_v35 = vmul.f32 1.442695, %v259_v34 }
  0x27   : > { %486 = vpow2.f32 %v260_v35 }
  0x31   : > { %v487_v36 = vpop.eup %486 }
  0x32   : > { %v263_v37 = vcombine.high %v487_v36, %v487_v36  ;;  %v265_v38 = vsel %vm240_vm0, %v487_v36, 0.0 }
  0x33   : > { %v266_v39 = vrot.slane %v265_v38, 4 }
  0x34   : > { %v272_v40 = vsel %vm240_vm0, %v263_v37, 0.0 }
  0x35   : > { %v267_v41 = vadd.f32 %v266_v39, %v265_v38  ;;  %v273_v42 = vrot.slane %v272_v40, 4 }
  0x37   : > { %v268_v43 = vrot.slane %v267_v41, 2  ;;  %v274_v44 = vadd.f32 %v273_v42, %v272_v40 }
  0x39   : > { %v269_v45 = vadd.f32 %v268_v43, %v267_v41  ;;  %v275_v46 = vrot.slane %v274_v44, 2 }
  0x3b   : > { %v270_v47 = vrot.slane %v269_v45, 1  ;;  %v276_v48 = vadd.f32 %v275_v46, %v274_v44 }
  0x3d   : > { %v271_v49 = vadd.f32 %v270_v47, %v269_v45  ;;  %v277_v50 = vrot.slane %v276_v48, 1 }
  0x3f   : > { %v278_v51 = vadd.f32 %v277_v50, %v276_v48  ;;  %488 = vrcp.f32 %v271_v49 }
  0x41   : > { %490 = vrcp.f32 %v278_v51 }
  0x49   : > { %v489_v52 = vpop.eup %488 }
  0x4b   : > { %v491_v53 = vpop.eup %490 }
  0x4c   : > { %v283_v54 = vcombine.low %v489_v52, %v491_v53 }
  0x4e   : > { %v285_v55 = vmul.f32 %v487_v36, %v283_v54 }
  0x50   : > { %v306_v56 = vmul.f32 %v304_v19, %v285_v55  ;;  %v311_v57 = vcombine.high %v285_v55, %v285_v55  ;;  %v321_v61 = vsel %vm240_vm0, %v285_v55, 0.0 }
  0x52   : > { %v310_v58 = vcombine.high %v306_v56, %v306_v56  ;;  %v316_v59 = vsel %vm240_vm0, %v306_v56, 0.0  ;;  %v322_v62 = vsel %vm240_vm0, %v311_v57, 0.0 }
  0x53   : > { %v323_v0 = vadd.f32 %v322_v62, %v321_v61 }
  0x54   : > { %v317_v60 = vsel %vm240_vm0, %v310_v58, 0.0 }
  0x55   : > { %v318_v63 = vadd.f32 %v317_v60, %v316_v59 }
  0x57   : > { %319 = vadd.xlane.f32.xlu0 %v318_v63 }
  0x5b   : > { %324 = vadd.xlane.f32.xlu0 %v323_v0 }
  0xa9   : > { %v330_v2 = vpop.xlane.xlu1 %329 }
  0xaa   : > { %v347_v4 = vrot.slane %v330_v2, %v554_v5 }
  0xe4   : > { %v320_v1 = vpop.xlane.xlu0 %319 }
  0xe5   : > { %v339_v6 = vrot.slane %v320_v1, %v554_v5 }
  0xe8   : > { %v325_v3 = vpop.xlane.xlu0 %324 }
  0xe9   : > { %v343_v7 = vrot.slane %v325_v3, %v554_v5 }
  0xeb   : > { %v349_v9 = vsel %vm348_vm4, %v343_v7, %v339_v6 }
  0xec   : > { %v351_v10 = vsel %vm350_vm5, %v347_v4, %v349_v9 }
  0xed   : > { %v353_v11 = vadd.f32 %v351_v10, %v307_v8 }
  0xef   : > { %355 = vst.msk [vmem:[%s227_s24] sm:$0x7] %vm233_vm3, %v353_v11 }
  0xf0 PF: > { %s12_s11 = sadd.s32 1, %s514_s11   ;;  %s591_s9 = smov %s510_s10 }
  0xf1   : > { %p9_p5 = scmp.ge.s32.totalorder %s12_s11, 4   ;;  %s592_s10 = smov %s594_s12 }
  0xf3   :  { %11 = sbr.rel (!%p9_p5) target bundleno = 2 (0x2), region = 65 }

</bundles_post_ra>
